<compile_context>
chip_gen: v7x
topology: tpu7x:2x2x1
jax: 0.10.0
libtpu: 0.0.40
codegen_flags: <defaults>
</compile_context>

<pallas_src>
import math
from functools import partial

import jax
import jax.numpy as jnp
from jax import lax
from jax.experimental import pallas as pl
from jax.experimental.pallas import tpu as pltpu


def _pick_heads_per_group(n_heads: int, head_dim: int, target_lanes: int = 256) -> int:
    """Largest divisor G of n_heads with G*head_dim <= target_lanes (256-wide MXU)."""
    best = 1
    for g in range(1, n_heads + 1):
        if n_heads % g == 0 and g * head_dim <= target_lanes:
            best = g
    return best


def _bert_attention_kernel(x_ref, mask_ref,
                           wq_ref, wk_ref, wv_ref, wo_ref,
                           bqkv_ref, bln_ref,
                           out_ref, xbf_ref,
                           *, eps: float, heads_per_group: int, head_dim: int):
    # x_ref    : (1, S, D)            f32   (residual path)
    # mask_ref : (1, 1, S)            f32   additive bias
    # wq/wk/wv : (n_groups, D, Wg)    bf16  (fully VMEM-resident; Wq pre-scaled)
    # wo_ref   : (n_groups, Wg, D)    bf16  (fully VMEM-resident)
    # bqkv_ref : (n_groups, 3, Wg)    f32   (bq_scaled, bk, bv)
    # bln_ref  : (3, D)               f32   (bo, gamma, beta)
    # out_ref  : (1, S, D)            f32   (doubles as the head-group accumulator)
    # xbf_ref  : (S, D)               bf16  scratch (x cast once per batch)
    g = pl.program_id(1)
    n_groups = pl.num_programs(1)

    @pl.when(g == 0)
    def _():
        xbf_ref[...] = x_ref[0].astype(jnp.bfloat16)

    x_bf = xbf_ref[...]                      # (S, D) bf16, cast once per batch

    wq = wq_ref[g]                           # (D, Wg) bf16 (scale folded in)
    wk = wk_ref[g]
    wv = wv_ref[g]
    wo = wo_ref[g]                           # (Wg, D) bf16
    b_all = bqkv_ref[g]                      # (3, Wg) f32

    # Wide (lane-dense) projections for the whole head group; f32 accumulate.
    q = jnp.dot(x_bf, wq, preferred_element_type=jnp.float32) + b_all[0:1]   # (S, Wg)
    k = jnp.dot(x_bf, wk, preferred_element_type=jnp.float32) + b_all[1:2]
    v = jnp.dot(x_bf, wv, preferred_element_type=jnp.float32) + b_all[2:3]

    mask = mask_ref[0]                       # (1, S) broadcasts over query rows

    # Per-head attention inside the group (contraction width is head_dim by
    # definition); static slices, no materialized transpose (dot_general dims).
    ctx_parts = []
    for i in range(heads_per_group):
        lo = i * head_dim
        hi = lo + head_dim
        qi = q[:, lo:hi].astype(jnp.bfloat16)          # (S, W)
        ki = k[:, lo:hi].astype(jnp.bfloat16)
        vi = v[:, lo:hi].astype(jnp.bfloat16)
        s = lax.dot_general(qi, ki, (((1,), (1,)), ((), ())),
                            preferred_element_type=jnp.float32)   # (S, S), pre-scaled
        s = s + mask
        s_max = jnp.max(s, axis=-1, keepdims=True)
        p = jnp.exp(s - s_max)
        p = p * pl.reciprocal(jnp.sum(p, axis=-1, keepdims=True), approx=True)
        # TODO(synk): attention-probability dropout is identity (eval mode).
        ctx_parts.append(
            lax.dot_general(p.astype(jnp.bfloat16), vi, (((1,), (0,)), ((), ())),
                            preferred_element_type=jnp.float32))  # (S, W)
    ctx = ctx_parts[0] if len(ctx_parts) == 1 else jnp.concatenate(ctx_parts, axis=-1)

    # Fold head merge + output dense: context @ Wo == sum_g ctx_g @ Wo[g*Wg:(g+1)*Wg, :]
    contrib = jnp.dot(ctx.astype(jnp.bfloat16), wo,
                      preferred_element_type=jnp.float32)         # (S, D)

    @pl.when(g == 0)
    def _():
        out_ref[0] = contrib                 # write, not zero-init + add

    @pl.when(g > 0)
    def _():
        out_ref[0] = out_ref[0] + contrib

    @pl.when(g == n_groups - 1)
    def _():
        # output dense bias + residual + BertLayerNorm (TF-style), all f32.
        # TODO(synk): hidden dropout is identity (eval mode).
        hidden = out_ref[0] + bln_ref[0:1] + x_ref[0]
        u = jnp.mean(hidden, axis=-1, keepdims=True)
        var = jnp.mean(jnp.square(hidden - u), axis=-1, keepdims=True)
        normed = (hidden - u) * lax.rsqrt(var + eps)
        out_ref[0] = (bln_ref[1:2] * normed + bln_ref[2:3]).astype(out_ref.dtype)


def bert_attention(x, attention_mask, params, n_heads, eps=1e-12):
    """x: (B, S, D) f32.  attention_mask: (B, S) f32 additive bias.

    params = (wq, bq, wk, bk, wv, bv, wo, bo, gamma, beta), weights pre-transposed
    to (D_in, D_out), biases/LN params 1-D (D,).  Returns (B, S, D) f32.
    """
    B, S, D = x.shape
    assert D % n_heads == 0
    W = D // n_heads
    G = _pick_heads_per_group(n_heads, W)          # heads per grid step
    n_groups = n_heads // G
    Wg = G * W

    wq, bq, wk, bk, wv, bv, wo, bo, gamma, beta = params

    # Fold 1/sqrt(head_dim) into the query projection (host side, once).
    scale = 1.0 / math.sqrt(W)
    wq_s = (wq * scale).astype(jnp.float32)
    bq_s = (bq * scale).astype(jnp.float32)

    # Host-side restructuring: per-group weight blocks + bf16 cast once.
    def group_cols(w):   # (D, D) -> (n_groups, D, Wg); group g = cols [g*Wg, (g+1)*Wg)
        return jnp.transpose(w.reshape(D, n_groups, Wg), (1, 0, 2)).astype(jnp.bfloat16)

    wq_g = group_cols(wq_s)
    wk_g = group_cols(wk)
    wv_g = group_cols(wv)
    wo_g = wo.reshape(n_groups, Wg, D).astype(jnp.bfloat16)   # group g = rows [g*Wg, (g+1)*Wg)

    bqkv = jnp.stack([bq_s,
                      bk.astype(jnp.float32),
                      bv.astype(jnp.float32)], axis=0)        # (3, D)
    bqkv_g = jnp.transpose(bqkv.reshape(3, n_groups, Wg), (1, 0, 2))   # (n_groups, 3, Wg)

    bln = jnp.stack([bo, gamma, beta], axis=0).astype(jnp.float32)     # (3, D)
    mask3 = attention_mask.reshape(B, 1, S).astype(jnp.float32)

    kernel = partial(_bert_attention_kernel, eps=eps,
                     heads_per_group=G, head_dim=W)

    resident = lambda shape: pl.BlockSpec(shape, lambda b, g: (0,) * len(shape))

    out = pl.pallas_call(
        kernel,
        out_shape=jax.ShapeDtypeStruct((B, S, D), jnp.float32),
        grid_spec=pltpu.PrefetchScalarGridSpec(
            num_scalar_prefetch=0,
            grid=(B, n_groups),                                # groups = reduction axis
            in_specs=[
                pl.BlockSpec((1, S, D), lambda b, g: (b, 0, 0)),   # x (f32, residual)
                pl.BlockSpec((1, 1, S), lambda b, g: (b, 0, 0)),   # additive mask
                resident((n_groups, D, Wg)),                       # Wq (resident, pre-scaled)
                resident((n_groups, D, Wg)),                       # Wk
                resident((n_groups, D, Wg)),                       # Wv
                resident((n_groups, Wg, D)),                       # Wo
                resident((n_groups, 3, Wg)),                       # packed q/k/v biases
                resident((3, D)),                                  # packed bo, gamma, beta
            ],
            out_specs=pl.BlockSpec((1, S, D), lambda b, g: (b, 0, 0)),
            scratch_shapes=[pltpu.VMEM((S, D), jnp.bfloat16)],     # x cast cache
        ),
        compiler_params=pltpu.CompilerParams(
            dimension_semantics=("parallel", "arbitrary")),
    )(x.astype(jnp.float32), mask3,
      wq_g, wk_g, wv_g, wo_g, bqkv_g, bln)
    return out


def _reference(x, attention_mask, params, n_heads, eps=1e-12):
    """Pure-JAX f32 reference mirroring the PyTorch BertAttention forward."""
    wq, bq, wk, bk, wv, bv, wo, bo, gamma, beta = params
    B, S, D = x.shape
    W = D // n_heads

    def proj(w, b):
        return (x @ w + b).reshape(B, S, n_heads, W).transpose(0, 2, 1, 3)  # (B,H,S,W)

    q, k, v = proj(wq, bq), proj(wk, bk), proj(wv, bv)
    scores = jnp.einsum("bhsw,bhtw->bhst", q, k) / math.sqrt(W)
    scores = scores + attention_mask[:, None, None, :]
    probs = jax.nn.softmax(scores, axis=-1)
    ctx = jnp.einsum("bhst,bhtw->bhsw", probs, v)
    ctx = ctx.transpose(0, 2, 1, 3).reshape(B, S, D)
    hidden = ctx @ wo + bo
    hidden = hidden + x
    u = hidden.mean(-1, keepdims=True)
    var = ((hidden - u) ** 2).mean(-1, keepdims=True)
    normed = (hidden - u) / jnp.sqrt(var + eps)
    return gamma * normed + beta


if __name__ == "__main__":
    # Small config: hidden=32, heads=4, batch=2, seq=8
    B, S, D, H = 2, 8, 32, 4

    key = jax.random.PRNGKey(0)
    keys = jax.random.split(key, 10)

    bound = 1.0 / math.sqrt(D)
    wq = jax.random.uniform(keys[0], (D, D), jnp.float32, -bound, bound)
    bq = jax.random.uniform(keys[1], (D,), jnp.float32, -bound, bound)
    wk = jax.random.uniform(keys[2], (D, D), jnp.float32, -bound, bound)
    bk = jax.random.uniform(keys[3], (D,), jnp.float32, -bound, bound)
    wv = jax.random.uniform(keys[4], (D, D), jnp.float32, -bound, bound)
    bv = jax.random.uniform(keys[5], (D,), jnp.float32, -bound, bound)
    wo = jax.random.uniform(keys[6], (D, D), jnp.float32, -bound, bound)
    bo = jax.random.uniform(keys[7], (D,), jnp.float32, -bound, bound)
    gamma = jnp.ones((D,), jnp.float32)     # BertLayerNorm init
    beta = jnp.zeros((D,), jnp.float32)
    params = (wq, bq, wk, bk, wv, bv, wo, bo, gamma, beta)

    x = jax.random.normal(keys[8], (B, S, D), jnp.float32)
    # Additive attention mask (standard BERT extended mask):
    # 0.0 = attend, -10000.0 = masked.  Mask the last 2 key positions of batch 1.
    attention_mask = jnp.zeros((B, S), jnp.float32)
    attention_mask = attention_mask.at[1, -2:].set(-10000.0)

    out = bert_attention(x, attention_mask, params, H)
    jax.block_until_ready(out)

    out_ref = _reference(x, attention_mask, params, H)
    # bf16 MXU operands + approx reciprocal -> tolerance looser than pure-f32.
    assert jnp.allclose(out, out_ref, atol=5e-2, rtol=5e-2), (
        "attention_output mismatch, max abs diff = "
        f"{float(jnp.max(jnp.abs(out - out_ref)))}")

    print("KERNEL_OK")
</pallas_src>

<mosaic_0001>
module attributes {stable_mosaic.version = 11 : i64} {
  func.func @_bert_attention_kernel(%arg0: i32, %arg1: i32, %arg2: memref<1x8x32xf32, #tpu.memory_space<vmem>>, %arg3: memref<1x1x8xf32, #tpu.memory_space<vmem>>, %arg4: memref<1x32x32xbf16, #tpu.memory_space<vmem>>, %arg5: memref<1x32x32xbf16, #tpu.memory_space<vmem>>, %arg6: memref<1x32x32xbf16, #tpu.memory_space<vmem>>, %arg7: memref<1x32x32xbf16, #tpu.memory_space<vmem>>, %arg8: memref<1x3x32xf32, #tpu.memory_space<vmem>>, %arg9: memref<3x32xf32, #tpu.memory_space<vmem>>, %arg10: memref<1x8x32xf32, #tpu.memory_space<vmem>>, %arg11: memref<8x32xbf16, #tpu.memory_space<vmem>>) attributes {dimension_semantics = [#tpu.dimension_semantics<parallel>, #tpu.dimension_semantics<arbitrary>], iteration_bounds = array<i64: 2, 1>, scalar_prefetch = 0 : i64, scratch_operands = 1 : i64, tpu.core_type = #tpu.core_type<tc>, window_params = [{transform_indices = @transform_0, window_bounds = array<i64: 1, 8, 32>}, {transform_indices = @transform_1, window_bounds = array<i64: 1, 1, 8>}, {pipeline_mode = #tpu.pipeline_mode<synchronous>, transform_indices = @transform_2, window_bounds = array<i64: 1, 32, 32>}, {pipeline_mode = #tpu.pipeline_mode<synchronous>, transform_indices = @transform_3, window_bounds = array<i64: 1, 32, 32>}, {pipeline_mode = #tpu.pipeline_mode<synchronous>, transform_indices = @transform_4, window_bounds = array<i64: 1, 32, 32>}, {pipeline_mode = #tpu.pipeline_mode<synchronous>, transform_indices = @transform_5, window_bounds = array<i64: 1, 32, 32>}, {pipeline_mode = #tpu.pipeline_mode<synchronous>, transform_indices = @transform_6, window_bounds = array<i64: 1, 3, 32>}, {pipeline_mode = #tpu.pipeline_mode<synchronous>, transform_indices = @transform_7, window_bounds = array<i64: 3, 32>}, {transform_indices = @transform_8, window_bounds = array<i64: 1, 8, 32>}]} {
    %c0_i32 = arith.constant 0 : i32
    %0 = arith.cmpi eq, %arg1, %c0_i32 : i32
    %1 = arith.extui %0 : i1 to i32
    %c0_i32_0 = arith.constant 0 : i32
    %2 = arith.cmpi ne, %1, %c0_i32_0 : i32
    scf.if %2 {
      %c0_40 = arith.constant 0 : index
      %c0_41 = arith.constant 0 : index
      %c0_42 = arith.constant 0 : index
      %129 = vector.load %arg2[%c0_40, %c0_41, %c0_42] : memref<1x8x32xf32, #tpu.memory_space<vmem>>, vector<1x8x32xf32>
      %130 = vector.shape_cast %129 : vector<1x8x32xf32> to vector<8x32xf32>
      %131 = arith.truncf %130 : vector<8x32xf32> to vector<8x32xbf16>
      %c0_43 = arith.constant 0 : index
      %c0_44 = arith.constant 0 : index
      %132 = vector.load %arg11[%c0_43, %c0_44] : memref<8x32xbf16, #tpu.memory_space<vmem>>, vector<8x32xbf16>
      tpu.vector_store %arg11[%c0_43, %c0_44], %131 {strides = array<i32>} : memref<8x32xbf16, #tpu.memory_space<vmem>>, vector<8x32xbf16>,
    } else {
    }
    %c0 = arith.constant 0 : index
    %c0_1 = arith.constant 0 : index
    %3 = vector.load %arg11[%c0, %c0_1] : memref<8x32xbf16, #tpu.memory_space<vmem>>, vector<8x32xbf16>
    %4 = arith.index_cast %arg1 : i32 to index
    %c0_2 = arith.constant 0 : index
    %c0_3 = arith.constant 0 : index
    %5 = vector.load %arg4[%4, %c0_2, %c0_3] : memref<1x32x32xbf16, #tpu.memory_space<vmem>>, vector<1x32x32xbf16>
    %6 = vector.shape_cast %5 : vector<1x32x32xbf16> to vector<32x32xbf16>
    %7 = arith.index_cast %arg1 : i32 to index
    %c0_4 = arith.constant 0 : index
    %c0_5 = arith.constant 0 : index
    %8 = vector.load %arg5[%7, %c0_4, %c0_5] : memref<1x32x32xbf16, #tpu.memory_space<vmem>>, vector<1x32x32xbf16>
    %9 = vector.shape_cast %8 : vector<1x32x32xbf16> to vector<32x32xbf16>
    %10 = arith.index_cast %arg1 : i32 to index
    %c0_6 = arith.constant 0 : index
    %c0_7 = arith.constant 0 : index
    %11 = vector.load %arg6[%10, %c0_6, %c0_7] : memref<1x32x32xbf16, #tpu.memory_space<vmem>>, vector<1x32x32xbf16>
    %12 = vector.shape_cast %11 : vector<1x32x32xbf16> to vector<32x32xbf16>
    %13 = arith.index_cast %arg1 : i32 to index
    %c0_8 = arith.constant 0 : index
    %c0_9 = arith.constant 0 : index
    %14 = vector.load %arg7[%13, %c0_8, %c0_9] : memref<1x32x32xbf16, #tpu.memory_space<vmem>>, vector<1x32x32xbf16>
    %15 = vector.shape_cast %14 : vector<1x32x32xbf16> to vector<32x32xbf16>
    %16 = arith.index_cast %arg1 : i32 to index
    %c0_10 = arith.constant 0 : index
    %c0_11 = arith.constant 0 : index
    %17 = vector.load %arg8[%16, %c0_10, %c0_11] : memref<1x3x32xf32, #tpu.memory_space<vmem>>, vector<1x3x32xf32>
    %18 = vector.shape_cast %17 : vector<1x3x32xf32> to vector<3x32xf32>
    %cst = arith.constant dense<0.000000e+00> : vector<8x32xf32>
    %19 = tpu.matmul %3, %6, %cst {dimension_numbers = #tpu.dot_dimension_numbers<[1], [0], [0], [1], [0, 0, 1, 1], [], []>} : vector<8x32xbf16>, vector<32x32xbf16>, vector<8x32xf32> -> vector<8x32xf32>
    %20 = vector.extract_strided_slice %18 {offsets = [0, 0], sizes = [1, 32], strides = [1, 1]} : vector<3x32xf32> to vector<1x32xf32>
    %21 = vector.broadcast %20 : vector<1x32xf32> to vector<8x32xf32>
    %22 = arith.addf %19, %21 : vector<8x32xf32>
    %cst_12 = arith.constant dense<0.000000e+00> : vector<8x32xf32>
    %23 = tpu.matmul %3, %9, %cst_12 {dimension_numbers = #tpu.dot_dimension_numbers<[1], [0], [0], [1], [0, 0, 1, 1], [], []>} : vector<8x32xbf16>, vector<32x32xbf16>, vector<8x32xf32> -> vector<8x32xf32>
    %24 = vector.extract_strided_slice %18 {offsets = [1, 0], sizes = [1, 32], strides = [1, 1]} : vector<3x32xf32> to vector<1x32xf32>
    %25 = vector.broadcast %24 : vector<1x32xf32> to vector<8x32xf32>
    %26 = arith.addf %23, %25 : vector<8x32xf32>
    %cst_13 = arith.constant dense<0.000000e+00> : vector<8x32xf32>
    %27 = tpu.matmul %3, %12, %cst_13 {dimension_numbers = #tpu.dot_dimension_numbers<[1], [0], [0], [1], [0, 0, 1, 1], [], []>} : vector<8x32xbf16>, vector<32x32xbf16>, vector<8x32xf32> -> vector<8x32xf32>
    %28 = vector.extract_strided_slice %18 {offsets = [2, 0], sizes = [1, 32], strides = [1, 1]} : vector<3x32xf32> to vector<1x32xf32>
    %29 = vector.broadcast %28 : vector<1x32xf32> to vector<8x32xf32>
    %30 = arith.addf %27, %29 : vector<8x32xf32>
    %c0_14 = arith.constant 0 : index
    %c0_15 = arith.constant 0 : index
    %c0_16 = arith.constant 0 : index
    %31 = vector.load %arg3[%c0_14, %c0_15, %c0_16] : memref<1x1x8xf32, #tpu.memory_space<vmem>>, vector<1x1x8xf32>
    %32 = vector.shape_cast %31 : vector<1x1x8xf32> to vector<1x8xf32>
    %33 = vector.extract_strided_slice %22 {offsets = [0, 0], sizes = [8, 8], strides = [1, 1]} : vector<8x32xf32> to vector<8x8xf32>
    %34 = arith.truncf %33 : vector<8x8xf32> to vector<8x8xbf16>
    %35 = vector.extract_strided_slice %26 {offsets = [0, 0], sizes = [8, 8], strides = [1, 1]} : vector<8x32xf32> to vector<8x8xf32>
    %36 = arith.truncf %35 : vector<8x8xf32> to vector<8x8xbf16>
    %37 = vector.extract_strided_slice %30 {offsets = [0, 0], sizes = [8, 8], strides = [1, 1]} : vector<8x32xf32> to vector<8x8xf32>
    %38 = arith.truncf %37 : vector<8x8xf32> to vector<8x8xbf16>
    %cst_17 = arith.constant dense<0.000000e+00> : vector<8x8xf32>
    %39 = tpu.matmul %34, %36, %cst_17 {dimension_numbers = #tpu.dot_dimension_numbers<[1], [1], [0], [0], [0, 0, 1, 0], [], []>} : vector<8x8xbf16>, vector<8x8xbf16>, vector<8x8xf32> -> vector<8x8xf32>
    %40 = vector.broadcast %32 : vector<1x8xf32> to vector<8x8xf32>
    %41 = arith.addf %39, %40 : vector<8x8xf32>
    %cst_18 = arith.constant dense<0xFF800000> : vector<8xf32>
    %42 = vector.multi_reduction <maximumf>, %41, %cst_18 [1] : vector<8x8xf32> to vector<8xf32>
    %43 = vector.shape_cast %42 : vector<8xf32> to vector<8x1xf32>
    %44 = vector.broadcast %43 : vector<8x1xf32> to vector<8x8xf32>
    %45 = arith.subf %41, %44 : vector<8x8xf32>
    %46 = math.exp %45 : vector<8x8xf32>
    %cst_19 = arith.constant dense<0.000000e+00> : vector<8xf32>
    %47 = vector.multi_reduction <add>, %46, %cst_19 [1] : vector<8x8xf32> to vector<8xf32>
    %48 = vector.shape_cast %47 : vector<8xf32> to vector<8x1xf32>
    %49 = tpu.reciprocal %48 {approx = true} : vector<8x1xf32> -> vector<8x1xf32>
    %50 = vector.broadcast %49 : vector<8x1xf32> to vector<8x8xf32>
    %51 = arith.mulf %46, %50 : vector<8x8xf32>
    %52 = arith.truncf %51 : vector<8x8xf32> to vector<8x8xbf16>
    %cst_20 = arith.constant dense<0.000000e+00> : vector<8x8xf32>
    %53 = tpu.matmul %52, %38, %cst_20 {dimension_numbers = #tpu.dot_dimension_numbers<[1], [0], [0], [1], [0, 0, 1, 1], [], []>} : vector<8x8xbf16>, vector<8x8xbf16>, vector<8x8xf32> -> vector<8x8xf32>
    %54 = vector.extract_strided_slice %22 {offsets = [0, 8], sizes = [8, 8], strides = [1, 1]} : vector<8x32xf32> to vector<8x8xf32>
    %55 = arith.truncf %54 : vector<8x8xf32> to vector<8x8xbf16>
    %56 = vector.extract_strided_slice %26 {offsets = [0, 8], sizes = [8, 8], strides = [1, 1]} : vector<8x32xf32> to vector<8x8xf32>
    %57 = arith.truncf %56 : vector<8x8xf32> to vector<8x8xbf16>
    %58 = vector.extract_strided_slice %30 {offsets = [0, 8], sizes = [8, 8], strides = [1, 1]} : vector<8x32xf32> to vector<8x8xf32>
    %59 = arith.truncf %58 : vector<8x8xf32> to vector<8x8xbf16>
    %cst_21 = arith.constant dense<0.000000e+00> : vector<8x8xf32>
    %60 = tpu.matmul %55, %57, %cst_21 {dimension_numbers = #tpu.dot_dimension_numbers<[1], [1], [0], [0], [0, 0, 1, 0], [], []>} : vector<8x8xbf16>, vector<8x8xbf16>, vector<8x8xf32> -> vector<8x8xf32>
    %61 = vector.broadcast %32 : vector<1x8xf32> to vector<8x8xf32>
    %62 = arith.addf %60, %61 : vector<8x8xf32>
    %cst_22 = arith.constant dense<0xFF800000> : vector<8xf32>
    %63 = vector.multi_reduction <maximumf>, %62, %cst_22 [1] : vector<8x8xf32> to vector<8xf32>
    %64 = vector.shape_cast %63 : vector<8xf32> to vector<8x1xf32>
    %65 = vector.broadcast %64 : vector<8x1xf32> to vector<8x8xf32>
    %66 = arith.subf %62, %65 : vector<8x8xf32>
    %67 = math.exp %66 : vector<8x8xf32>
    %cst_23 = arith.constant dense<0.000000e+00> : vector<8xf32>
    %68 = vector.multi_reduction <add>, %67, %cst_23 [1] : vector<8x8xf32> to vector<8xf32>
    %69 = vector.shape_cast %68 : vector<8xf32> to vector<8x1xf32>
    %70 = tpu.reciprocal %69 {approx = true} : vector<8x1xf32> -> vector<8x1xf32>
    %71 = vector.broadcast %70 : vector<8x1xf32> to vector<8x8xf32>
    %72 = arith.mulf %67, %71 : vector<8x8xf32>
    %73 = arith.truncf %72 : vector<8x8xf32> to vector<8x8xbf16>
    %cst_24 = arith.constant dense<0.000000e+00> : vector<8x8xf32>
    %74 = tpu.matmul %73, %59, %cst_24 {dimension_numbers = #tpu.dot_dimension_numbers<[1], [0], [0], [1], [0, 0, 1, 1], [], []>} : vector<8x8xbf16>, vector<8x8xbf16>, vector<8x8xf32> -> vector<8x8xf32>
    %75 = vector.extract_strided_slice %22 {offsets = [0, 16], sizes = [8, 8], strides = [1, 1]} : vector<8x32xf32> to vector<8x8xf32>
    %76 = arith.truncf %75 : vector<8x8xf32> to vector<8x8xbf16>
    %77 = vector.extract_strided_slice %26 {offsets = [0, 16], sizes = [8, 8], strides = [1, 1]} : vector<8x32xf32> to vector<8x8xf32>
    %78 = arith.truncf %77 : vector<8x8xf32> to vector<8x8xbf16>
    %79 = vector.extract_strided_slice %30 {offsets = [0, 16], sizes = [8, 8], strides = [1, 1]} : vector<8x32xf32> to vector<8x8xf32>
    %80 = arith.truncf %79 : vector<8x8xf32> to vector<8x8xbf16>
    %cst_25 = arith.constant dense<0.000000e+00> : vector<8x8xf32>
    %81 = tpu.matmul %76, %78, %cst_25 {dimension_numbers = #tpu.dot_dimension_numbers<[1], [1], [0], [0], [0, 0, 1, 0], [], []>} : vector<8x8xbf16>, vector<8x8xbf16>, vector<8x8xf32> -> vector<8x8xf32>
    %82 = vector.broadcast %32 : vector<1x8xf32> to vector<8x8xf32>
    %83 = arith.addf %81, %82 : vector<8x8xf32>
    %cst_26 = arith.constant dense<0xFF800000> : vector<8xf32>
    %84 = vector.multi_reduction <maximumf>, %83, %cst_26 [1] : vector<8x8xf32> to vector<8xf32>
    %85 = vector.shape_cast %84 : vector<8xf32> to vector<8x1xf32>
    %86 = vector.broadcast %85 : vector<8x1xf32> to vector<8x8xf32>
    %87 = arith.subf %83, %86 : vector<8x8xf32>
    %88 = math.exp %87 : vector<8x8xf32>
    %cst_27 = arith.constant dense<0.000000e+00> : vector<8xf32>
    %89 = vector.multi_reduction <add>, %88, %cst_27 [1] : vector<8x8xf32> to vector<8xf32>
    %90 = vector.shape_cast %89 : vector<8xf32> to vector<8x1xf32>
    %91 = tpu.reciprocal %90 {approx = true} : vector<8x1xf32> -> vector<8x1xf32>
    %92 = vector.broadcast %91 : vector<8x1xf32> to vector<8x8xf32>
    %93 = arith.mulf %88, %92 : vector<8x8xf32>
    %94 = arith.truncf %93 : vector<8x8xf32> to vector<8x8xbf16>
    %cst_28 = arith.constant dense<0.000000e+00> : vector<8x8xf32>
    %95 = tpu.matmul %94, %80, %cst_28 {dimension_numbers = #tpu.dot_dimension_numbers<[1], [0], [0], [1], [0, 0, 1, 1], [], []>} : vector<8x8xbf16>, vector<8x8xbf16>, vector<8x8xf32> -> vector<8x8xf32>
    %96 = vector.extract_strided_slice %22 {offsets = [0, 24], sizes = [8, 8], strides = [1, 1]} : vector<8x32xf32> to vector<8x8xf32>
    %97 = arith.truncf %96 : vector<8x8xf32> to vector<8x8xbf16>
    %98 = vector.extract_strided_slice %26 {offsets = [0, 24], sizes = [8, 8], strides = [1, 1]} : vector<8x32xf32> to vector<8x8xf32>
    %99 = arith.truncf %98 : vector<8x8xf32> to vector<8x8xbf16>
    %100 = vector.extract_strided_slice %30 {offsets = [0, 24], sizes = [8, 8], strides = [1, 1]} : vector<8x32xf32> to vector<8x8xf32>
    %101 = arith.truncf %100 : vector<8x8xf32> to vector<8x8xbf16>
    %cst_29 = arith.constant dense<0.000000e+00> : vector<8x8xf32>
    %102 = tpu.matmul %97, %99, %cst_29 {dimension_numbers = #tpu.dot_dimension_numbers<[1], [1], [0], [0], [0, 0, 1, 0], [], []>} : vector<8x8xbf16>, vector<8x8xbf16>, vector<8x8xf32> -> vector<8x8xf32>
    %103 = vector.broadcast %32 : vector<1x8xf32> to vector<8x8xf32>
    %104 = arith.addf %102, %103 : vector<8x8xf32>
    %cst_30 = arith.constant dense<0xFF800000> : vector<8xf32>
    %105 = vector.multi_reduction <maximumf>, %104, %cst_30 [1] : vector<8x8xf32> to vector<8xf32>
    %106 = vector.shape_cast %105 : vector<8xf32> to vector<8x1xf32>
    %107 = vector.broadcast %106 : vector<8x1xf32> to vector<8x8xf32>
    %108 = arith.subf %104, %107 : vector<8x8xf32>
    %109 = math.exp %108 : vector<8x8xf32>
    %cst_31 = arith.constant dense<0.000000e+00> : vector<8xf32>
    %110 = vector.multi_reduction <add>, %109, %cst_31 [1] : vector<8x8xf32> to vector<8xf32>
    %111 = vector.shape_cast %110 : vector<8xf32> to vector<8x1xf32>
    %112 = tpu.reciprocal %111 {approx = true} : vector<8x1xf32> -> vector<8x1xf32>
    %113 = vector.broadcast %112 : vector<8x1xf32> to vector<8x8xf32>
    %114 = arith.mulf %109, %113 : vector<8x8xf32>
    %115 = arith.truncf %114 : vector<8x8xf32> to vector<8x8xbf16>
    %cst_32 = arith.constant dense<0.000000e+00> : vector<8x8xf32>
    %116 = tpu.matmul %115, %101, %cst_32 {dimension_numbers = #tpu.dot_dimension_numbers<[1], [0], [0], [1], [0, 0, 1, 1], [], []>} : vector<8x8xbf16>, vector<8x8xbf16>, vector<8x8xf32> -> vector<8x8xf32>
    %117 = tpu.concatenate %53, %74, %95, %116 in 1 : vector<8x8xf32>, vector<8x8xf32>, vector<8x8xf32>, vector<8x8xf32> -> vector<8x32xf32>
    %118 = arith.truncf %117 : vector<8x32xf32> to vector<8x32xbf16>
    %cst_33 = arith.constant dense<0.000000e+00> : vector<8x32xf32>
    %119 = tpu.matmul %118, %15, %cst_33 {dimension_numbers = #tpu.dot_dimension_numbers<[1], [0], [0], [1], [0, 0, 1, 1], [], []>} : vector<8x32xbf16>, vector<32x32xbf16>, vector<8x32xf32> -> vector<8x32xf32>
    %c0_i32_34 = arith.constant 0 : i32
    %120 = arith.cmpi eq, %arg1, %c0_i32_34 : i32
    %121 = arith.extui %120 : i1 to i32
    %c0_i32_35 = arith.constant 0 : i32
    %122 = arith.cmpi ne, %121, %c0_i32_35 : i32
    scf.if %122 {
      %c0_40 = arith.constant 0 : index
      %c0_41 = arith.constant 0 : index
      %c0_42 = arith.constant 0 : index
      %129 = vector.load %arg10[%c0_40, %c0_41, %c0_42] : memref<1x8x32xf32, #tpu.memory_space<vmem>>, vector<1x8x32xf32>
      %130 = vector.shape_cast %129 : vector<1x8x32xf32> to vector<8x32xf32>
      %131 = vector.shape_cast %119 : vector<8x32xf32> to vector<1x8x32xf32>
      tpu.vector_store %arg10[%c0_40, %c0_41, %c0_42], %131 {strides = array<i32>} : memref<1x8x32xf32, #tpu.memory_space<vmem>>, vector<1x8x32xf32>,
    } else {
    }
    %c0_i32_36 = arith.constant 0 : i32
    %123 = arith.cmpi sgt, %arg1, %c0_i32_36 : i32
    %124 = arith.extui %123 : i1 to i32
    %c0_i32_37 = arith.constant 0 : i32
    %125 = arith.cmpi ne, %124, %c0_i32_37 : i32
    scf.if %125 {
      %c0_40 = arith.constant 0 : index
      %c0_41 = arith.constant 0 : index
      %c0_42 = arith.constant 0 : index
      %129 = vector.load %arg10[%c0_40, %c0_41, %c0_42] : memref<1x8x32xf32, #tpu.memory_space<vmem>>, vector<1x8x32xf32>
      %130 = vector.shape_cast %129 : vector<1x8x32xf32> to vector<8x32xf32>
      %131 = arith.addf %130, %119 : vector<8x32xf32>
      %c0_43 = arith.constant 0 : index
      %c0_44 = arith.constant 0 : index
      %c0_45 = arith.constant 0 : index
      %132 = vector.load %arg10[%c0_43, %c0_44, %c0_45] : memref<1x8x32xf32, #tpu.memory_space<vmem>>, vector<1x8x32xf32>
      %133 = vector.shape_cast %132 : vector<1x8x32xf32> to vector<8x32xf32>
      %134 = vector.shape_cast %131 : vector<8x32xf32> to vector<1x8x32xf32>
      tpu.vector_store %arg10[%c0_43, %c0_44, %c0_45], %134 {strides = array<i32>} : memref<1x8x32xf32, #tpu.memory_space<vmem>>, vector<1x8x32xf32>,
    } else {
    }
    %c0_i32_38 = arith.constant 0 : i32
    %126 = arith.cmpi eq, %arg1, %c0_i32_38 : i32
    %127 = arith.extui %126 : i1 to i32
    %c0_i32_39 = arith.constant 0 : i32
    %128 = arith.cmpi ne, %127, %c0_i32_39 : i32
    scf.if %128 {
      %c0_40 = arith.constant 0 : index
      %c0_41 = arith.constant 0 : index
      %c0_42 = arith.constant 0 : index
      %129 = vector.load %arg10[%c0_40, %c0_41, %c0_42] : memref<1x8x32xf32, #tpu.memory_space<vmem>>, vector<1x8x32xf32>
      %130 = vector.shape_cast %129 : vector<1x8x32xf32> to vector<8x32xf32>
      %c0_43 = arith.constant 0 : index
      %c0_44 = arith.constant 0 : index
      %131 = vector.load %arg9[%c0_43, %c0_44] : memref<3x32xf32, #tpu.memory_space<vmem>>, vector<1x32xf32>
      %132 = vector.broadcast %131 : vector<1x32xf32> to vector<8x32xf32>
      %133 = arith.addf %130, %132 : vector<8x32xf32>
      %c0_45 = arith.constant 0 : index
      %c0_46 = arith.constant 0 : index
      %c0_47 = arith.constant 0 : index
      %134 = vector.load %arg2[%c0_45, %c0_46, %c0_47] : memref<1x8x32xf32, #tpu.memory_space<vmem>>, vector<1x8x32xf32>
      %135 = vector.shape_cast %134 : vector<1x8x32xf32> to vector<8x32xf32>
      %136 = arith.addf %133, %135 : vector<8x32xf32>
      %cst_48 = arith.constant dense<0.000000e+00> : vector<8xf32>
      %137 = vector.multi_reduction <add>, %136, %cst_48 [1] : vector<8x32xf32> to vector<8xf32>
      %138 = vector.shape_cast %137 : vector<8xf32> to vector<8x1xf32>
      %cst_49 = arith.constant 3.200000e+01 : f32
      %139 = vector.broadcast %cst_49 : f32 to vector<8x1xf32>
      %140 = arith.divf %138, %139 : vector<8x1xf32>
      %141 = vector.broadcast %140 : vector<8x1xf32> to vector<8x32xf32>
      %142 = arith.subf %136, %141 : vector<8x32xf32>
      %143 = arith.mulf %142, %142 : vector<8x32xf32>
      %cst_50 = arith.constant dense<0.000000e+00> : vector<8xf32>
      %144 = vector.multi_reduction <add>, %143, %cst_50 [1] : vector<8x32xf32> to vector<8xf32>
      %145 = vector.shape_cast %144 : vector<8xf32> to vector<8x1xf32>
      %cst_51 = arith.constant 3.200000e+01 : f32
      %146 = vector.broadcast %cst_51 : f32 to vector<8x1xf32>
      %147 = arith.divf %145, %146 : vector<8x1xf32>
      %148 = vector.broadcast %140 : vector<8x1xf32> to vector<8x32xf32>
      %149 = arith.subf %136, %148 : vector<8x32xf32>
      %cst_52 = arith.constant 9.99999996E-13 : f32
      %150 = vector.broadcast %cst_52 : f32 to vector<8x1xf32>
      %151 = arith.addf %147, %150 : vector<8x1xf32>
      %152 = math.rsqrt %151 : vector<8x1xf32>
      %153 = vector.broadcast %152 : vector<8x1xf32> to vector<8x32xf32>
      %154 = arith.mulf %149, %153 : vector<8x32xf32>
      %c1 = arith.constant 1 : index
      %c0_53 = arith.constant 0 : index
      %155 = vector.load %arg9[%c1, %c0_53] : memref<3x32xf32, #tpu.memory_space<vmem>>, vector<1x32xf32>
      %156 = vector.broadcast %155 : vector<1x32xf32> to vector<8x32xf32>
      %157 = arith.mulf %156, %154 : vector<8x32xf32>
      %c2 = arith.constant 2 : index
      %c0_54 = arith.constant 0 : index
      %158 = vector.load %arg9[%c2, %c0_54] : memref<3x32xf32, #tpu.memory_space<vmem>>, vector<1x32xf32>
      %159 = vector.broadcast %158 : vector<1x32xf32> to vector<8x32xf32>
      %160 = arith.addf %157, %159 : vector<8x32xf32>
      %c0_55 = arith.constant 0 : index
      %c0_56 = arith.constant 0 : index
      %c0_57 = arith.constant 0 : index
      %161 = vector.load %arg10[%c0_55, %c0_56, %c0_57] : memref<1x8x32xf32, #tpu.memory_space<vmem>>, vector<1x8x32xf32>
      %162 = vector.shape_cast %161 : vector<1x8x32xf32> to vector<8x32xf32>
      %163 = vector.shape_cast %160 : vector<8x32xf32> to vector<1x8x32xf32>
      tpu.vector_store %arg10[%c0_55, %c0_56, %c0_57], %163 {strides = array<i32>} : memref<1x8x32xf32, #tpu.memory_space<vmem>>, vector<1x8x32xf32>,
    } else {
    }
    return
  }
  func.func @transform_0(%arg0: i32, %arg1: i32) -> (i32, i32, i32) {
    %c0_i32 = arith.constant 0 : i32
    %c0_i32_0 = arith.constant 0 : i32
    %c0_i32_1 = arith.constant 0 : i32
    return %arg0, %c0_i32, %c0_i32_0 : i32, i32, i32
  }
  func.func @transform_1(%arg0: i32, %arg1: i32) -> (i32, i32, i32) {
    %c0_i32 = arith.constant 0 : i32
    %c0_i32_0 = arith.constant 0 : i32
    %c0_i32_1 = arith.constant 0 : i32
    return %arg0, %c0_i32, %c0_i32_0 : i32, i32, i32
  }
  func.func @transform_2(%arg0: i32, %arg1: i32) -> (i32, i32, i32) {
    %c0_i32 = arith.constant 0 : i32
    %c0_i32_0 = arith.constant 0 : i32
    %c0_i32_1 = arith.constant 0 : i32
    %c0_i32_2 = arith.constant 0 : i32
    return %c0_i32, %c0_i32_0, %c0_i32_1 : i32, i32, i32
  }
  func.func @transform_3(%arg0: i32, %arg1: i32) -> (i32, i32, i32) {
    %c0_i32 = arith.constant 0 : i32
    %c0_i32_0 = arith.constant 0 : i32
    %c0_i32_1 = arith.constant 0 : i32
    %c0_i32_2 = arith.constant 0 : i32
    return %c0_i32, %c0_i32_0, %c0_i32_1 : i32, i32, i32
  }
  func.func @transform_4(%arg0: i32, %arg1: i32) -> (i32, i32, i32) {
    %c0_i32 = arith.constant 0 : i32
    %c0_i32_0 = arith.constant 0 : i32
    %c0_i32_1 = arith.constant 0 : i32
    %c0_i32_2 = arith.constant 0 : i32
    return %c0_i32, %c0_i32_0, %c0_i32_1 : i32, i32, i32
  }
  func.func @transform_5(%arg0: i32, %arg1: i32) -> (i32, i32, i32) {
    %c0_i32 = arith.constant 0 : i32
    %c0_i32_0 = arith.constant 0 : i32
    %c0_i32_1 = arith.constant 0 : i32
    %c0_i32_2 = arith.constant 0 : i32
    return %c0_i32, %c0_i32_0, %c0_i32_1 : i32, i32, i32
  }
  func.func @transform_6(%arg0: i32, %arg1: i32) -> (i32, i32, i32) {
    %c0_i32 = arith.constant 0 : i32
    %c0_i32_0 = arith.constant 0 : i32
    %c0_i32_1 = arith.constant 0 : i32
    %c0_i32_2 = arith.constant 0 : i32
    return %c0_i32, %c0_i32_0, %c0_i32_1 : i32, i32, i32
  }
  func.func @transform_7(%arg0: i32, %arg1: i32) -> (i32, i32) {
    %c0_i32 = arith.constant 0 : i32
    %c0_i32_0 = arith.constant 0 : i32
    %c0_i32_1 = arith.constant 0 : i32
    return %c0_i32, %c0_i32_0 : i32, i32
  }
  func.func @transform_8(%arg0: i32, %arg1: i32) -> (i32, i32, i32) {
    %c0_i32 = arith.constant 0 : i32
    %c0_i32_0 = arith.constant 0 : i32
    %c0_i32_1 = arith.constant 0 : i32
    return %arg0, %c0_i32, %c0_i32_0 : i32, i32, i32
  }
}

</mosaic_0001>

<bundles_post_ra>
// kernel: tpu_custom_call.1
= control target key start
LH: loop header
LB: loop body
LE: loop exit
PB: predicated region body
PF: predicated region fallthrough
CT: control target
= control target key end

     0   :  { %s2272_s0 = inlined_call_operand.hbm [shape: f32[2,8,32], index: 0, kind: input, shape index: {}]   ;;  %s2273_s1 = inlined_call_operand.vmem [shape: f32[2,1,8], index: 1, kind: input, shape index: {}]   ;;  %s2274_s2 = inlined_call_operand.hbm [shape: bf16[1,32,32], index: 2, kind: input, shape index: {}]   ;;  %s2275_s3 = inlined_call_operand.vmem [shape: bf16[1,32,32], index: 3, kind: input, shape index: {}]   ;;  %s2276_s4 = inlined_call_operand.hbm [shape: bf16[1,32,32], index: 4, kind: input, shape index: {}]   ;;  %s2277_s5 = inlined_call_operand.hbm [shape: bf16[1,32,32], index: 5, kind: input, shape index: {}]   ;;  %s2278_s6 = inlined_call_operand.vmem [shape: f32[1,3,32], index: 6, kind: input, shape index: {}]   ;;  %s2279_s7 = inlined_call_operand.vmem [shape: f32[3,32], index: 7, kind: input, shape index: {}]   ;;  %s2280_s8 = inlined_call_operand.hbm [shape: f32[2,8,32], index: 8, kind: output, shape index: {}]  }
   0x1   :  { %2289 = sst [smem:[#allocation18_spill]] %s2273_s1 }
   0x2   :  { %2290 = sst [smem:[#allocation19_spill]] %s2279_s7 }
   0x3   :  { %2291 = sst [smem:[#allocation20_spill]] %s2280_s8 }
   0x4   :  { %13 = vsyncpa [#allocation4], 0 }
   0x5   :  { %15 = vsyncpa [#allocation4 + $0x1], 0 }
   0x6   :  { %16 = vsyncpa [#allocation7], 0 }
   0x7   :  { %17 = vsyncpa [#allocation10], 0 }
   0x8   :  { %18 = vsyncpa [#allocation5], 0 }
   0x9   :  { %20 = vsyncpa [#allocation5 + $0x1], 0  ;;  %s1858_s27 = smov 0   ;;  %s1860_s28 = smov 0  }
   0xa   :  { %s1862_s29 = smov 0   ;;  %s1864_s30 = smov 0  }
   0xb   :  { %s1866_s9 = smov 0   ;;  %s1868_s10 = smov 0  }
   0xc LB: > { %2292 = sst [smem:[#allocation16_spill]] %s1776_s27  ;;  %s1312_s11 = sadd.s32 4294967295, %s1796_s10   ;;  %s1796_s10 = sphi %s1868_s10, %s26_s10   ;;  %s1792_s9 = sphi %s1866_s9, %s2318_s9   ;;  %s1788_s30 = sphi %s1864_s30, %s2317_s30   ;;  %s1784_s29 = sphi %s1862_s29, %s2316_s29   ;;  %s1780_s28 = sphi %s1860_s28, %s2315_s28   ;;  %s1776_s27 = sphi %s1858_s27, %s2314_s27  }
   0xd   : > { %s1313_s12 = sadd.s32 4294967294, %s1796_s10   ;;  %p58_p0 = scmp.ne.s32.totalorder %s1780_s28, %s1776_s27 }
   0xe   : > { %p1892_p1 = scmp.eq.s32.totalorder %s1312_s11, 0  ;;  %p1896_p2 = scmp.eq.s32.totalorder %s1312_s11, 1 }
   0xf   : > { %p240_p3 = scmp.eq.s32.totalorder %s1313_s12, 1  ;;  %p1314_p5 = scmp.ge.s32.totalorder %s1796_s10, 1 }
  0x10   : > { %s2293_s13 = scalar_select %p1892_p1, 1, 0 }
  0x11   : > { %s2294_s14 = scalar_select %p1896_p2, 1, 0 }
  0x12   : > { %p1902_p4 = por %p1892_p1, %p58_p0  ;;  %p1907_p6 = por %p240_p3, %p58_p0 }
  0x13   : > { %p247_p7 = scmp.lt.s32.totalorder %s1796_s10, 3  ;;  %s1798_s18 = smov [#allocation6]  }
  0x14   : > { %s2295_s15 = scalar_select %p1902_p4, 1, 0 }
  0x15   : > { %s2296_s16 = scalar_select %p1907_p6, 1, 0 }
  0x16   : > { %p1912_p8 = pnand %p1314_p5, %p247_p7  ;;  %s259_s19 = sshll.u32 %s1798_s18, 4  ;;  %s1916_s19 = int_to_ptr.vmem [resolvable:$true] %s259_s19 }
  0x17   : > { %2297 = sst [smem:[#allocation17_spill]] %s2296_s16  ;;  %s1799_s21 = smov [#allocation8]  }
  0x18   : > { %s2298_s17 = scalar_select %p1912_p8, 1, 0 }
  0x19   : > { %p1479_p9 = pneg %p1912_p8  ;;  %s275_s22 = sshll.u32 %s1799_s21, 4  ;;  %s1927_s22 = int_to_ptr.vmem [resolvable:$true] %s275_s22 }
  0x1a   : > { %s1800_s23 = smov [#allocation9]   ;;  %s1592_s11 = scalar_lea.hbm %s2274_s2, 256 }
  0x1b   : > { %p1923_p11 = pnand %p1479_p9, %p1892_p1  ;;  %s1929_s24 = sshll.u32 %s1800_s23, 4  ;;  %s289_s24 = int_to_ptr.vmem [resolvable:$true] %s1929_s24 }
  0x1c   : > { %p1593_p12 = scmp.ne.s32.totalorder %s2274_s2, %s1592_s11  ;;  %p1599_p5 = scmp.lt.u32.totalorder %s1592_s11, %s2274_s2 }
  0x1d   : > { %p1939_p13 = pneg %p1923_p11 }
  0x1f   : > { %p1595_p0 = pnand %p1939_p13, %p1593_p12 }
  0x21   : > { %p1596_p3 = pneg %p1595_p0 }
  0x23   : > { %p1601_p7 = pnand %p1599_p5, %p1596_p3 }
  0x25   : > { %1604 = shalt.err (!%p1601_p7)
}
  0x26   : > { %s1605_s25 = scalar_lea.vmem %s1916_s19, 256  ;;  %p1613_p1 = scmp.lt.s32.totalorder %s1916_s19, %s1916_s19 }
  0x27   : > { %p1606_p9 = scmp.ne.s32.totalorder %s1916_s19, %s1605_s25  ;;  %p1614_p4 = scmp.lt.s32.totalorder %s1605_s25, %s1605_s25 }
  0x29   : > { %p1608_p10 = pnand %p1606_p9, %p1939_p13  ;;  %p1615_p12 = por %p1614_p4, %p1613_p1 }
  0x2b   : > { %p1609_p6 = pneg %p1608_p10 }
  0x2d   : > { %p1616_p0 = pnand %p1615_p12, %p1609_p6 }
  0x2f   : > { %1619 = shalt.err (!%p1616_p0)
}
  0x30   : > { %s1801_s26 = smov 64   ;;  %s1802_s11 = smov 4  }
  0x31   : > { %1482 = dma.hbm_to_vmem [thread:$0]  (!%p1923_p11), %s2274_s2, 256, %s1916_s19, [#allocation7], %s1801_s26, %s1801_s26, %s1802_s11  }
  0x32   : > { %s1620_s25 = scalar_lea.hbm %s2276_s4, 256 }
  0x33   : > { %p1621_p1 = scmp.ne.s32.totalorder %s2276_s4, %s1620_s25  ;;  %p1627_p10 = scmp.lt.u32.totalorder %s1620_s25, %s2276_s4 }
  0x35   : > { %p1623_p4 = pnand %p1621_p1, %p1939_p13 }
  0x37   : > { %p1624_p6 = pneg %p1623_p4 }
  0x39   : > { %p1629_p3 = pnand %p1627_p10, %p1624_p6 }
  0x3b   : > { %1632 = shalt.err (!%p1629_p3)
}
  0x3c   : > { %s1633_s19 = scalar_lea.vmem %s1927_s22, 256  ;;  %p1641_p12 = scmp.lt.s32.totalorder %s1927_s22, %s1927_s22 }
  0x3d   : > { %p1634_p5 = scmp.ne.s32.totalorder %s1927_s22, %s1633_s19  ;;  %p1642_p0 = scmp.lt.s32.totalorder %s1633_s19, %s1633_s19 }
  0x3f   : > { %p1636_p7 = pnand %p1634_p5, %p1939_p13  ;;  %p1643_p1 = por %p1642_p0, %p1641_p12 }
  0x41   : > { %p1637_p9 = pneg %p1636_p7 }
  0x43   : > { %p1644_p4 = pnand %p1643_p1, %p1637_p9 }
  0x45   : > { %1647 = shalt.err (!%p1644_p4)
}
  0x46   : > { %1485 = dma.hbm_to_vmem [thread:$0]  (!%p1923_p11), %s2276_s4, 256, %s1927_s22, [#allocation7], %s1801_s26, %s1801_s26, %s1802_s11  }
  0x47   : > { %s1648_s12 = scalar_lea.hbm %s2277_s5, 256 }
  0x48   : > { %p1649_p6 = scmp.ne.s32.totalorder %s2277_s5, %s1648_s12  ;;  %p1655_p5 = scmp.lt.u32.totalorder %s1648_s12, %s2277_s5 }
  0x4a   : > { %p1651_p10 = pnand %p1649_p6, %p1939_p13 }
  0x4c   : > { %p1652_p3 = pneg %p1651_p10 }
  0x4e   : > { %p1657_p7 = pnand %p1655_p5, %p1652_p3 }
  0x50   : > { %1660 = shalt.err (!%p1657_p7)
}
  0x51   : > { %s1661_s19 = scalar_lea.vmem %s289_s24, 256  ;;  %p1669_p1 = scmp.lt.s32.totalorder %s289_s24, %s289_s24 }
  0x52   : > { %p1662_p9 = scmp.ne.s32.totalorder %s289_s24, %s1661_s19  ;;  %p1670_p4 = scmp.lt.s32.totalorder %s1661_s19, %s1661_s19 }
  0x54   : > { %p1664_p12 = pnand %p1662_p9, %p1939_p13  ;;  %p1671_p8 = por %p1670_p4, %p1669_p1 }
  0x56   : > { %p1665_p0 = pneg %p1664_p12 }
  0x58   : > { %p1672_p2 = pnand %p1671_p8, %p1665_p0 }
  0x5a   : > { %1675 = shalt.err (!%p1672_p2)
}
  0x5b   : > { %1488 = dma.hbm_to_vmem [thread:$0]  (!%p1923_p11), %s2277_s5, 256, %s289_s24, [#allocation10], %s1801_s26, %s1801_s26, %s1802_s11  }
  0x5c   : > { %s45_s16 = sadd.s32 1, %s1784_s29  ;;  %s38_s20 = sadd.s32 1, %s1792_s9 }
  0x5d   : > { %p52_p2 = scmp.ne.s32.totalorder %s1784_s29, %s1780_s28  ;;  %p40_p8 = scmp.ge.s32.totalorder %s38_s20, 2 }
  0x5e   : > { %p53_p13 = scmp.eq.s32.totalorder %s1796_s10, 0  ;;  %p2301_p6 = scmp.ne.s32.totalorder %s2294_s14, 0 }
  0x5f   : > { %p1500_p3 = scmp.lt.s32.totalorder %s1796_s10, 2  ;;  %s2320_s20 = smov (%p40_p8, %s38_s20), 0 }
  0x60   : > { %p2018_p10 = por %p2301_p6, %p52_p2  ;;  %p54_p5 = por %p53_p13, %p52_p2 }
  0x61   : > { %s308_s8 = sand.u32 1, %s1784_s29   ;;  %s42_s27 = ssub.s32 %s1792_s9, %s2320_s20 }
  0x62   : > { %p43_p7 = scmp.eq.s32.totalorder %s42_s27, 0  ;;  %s1319_s24 = sshll.u32 %s308_s8, 3 }
  0x63   : > { %s1320_s26 = sshll.u32 %s1792_s9, 7  ;;  %s312_s21 = scalar_lea.vmem [#allocation3], %s1319_s24 }
  0x64   : > { %s2030_s11 = scalar_select %p43_p7, %s1784_s29, %s45_s16  }
  0x65   : > { %s2035_s14 = scalar_lea.hbm %s2272_s0, %s1320_s26  ;;  %s319_s23 = sshll.u32 %s312_s21, 4  ;;  %s2037_s23 = int_to_ptr.vmem [resolvable:$true] %s319_s23 }
  0x66   : > { %p2041_p11 = pnand %p1500_p3, %p54_p5  ;;  %s309_s19 = scalar_lea.sflag [#allocation4], %s308_s8 }
  0x67   : > { %s1676_s22 = scalar_lea.hbm %s2035_s14, 128  ;;  %s1681_s27 = scalar_lea.hbm %s2272_s0, 256 }
  0x68   : > { %p1677_p9 = scmp.ne.s32.totalorder %s2035_s14, %s1676_s22  ;;  %p1678_p12 = pneg %p2041_p11 }
  0x69   : > { %p1682_p4 = scmp.lt.u32.totalorder %s2035_s14, %s2272_s0  ;;  %p1683_p2 = scmp.lt.u32.totalorder %s1681_s27, %s1676_s22 }
  0x6a   : > { %p1679_p0 = pnand %p1678_p12, %p1677_p9  ;;  %p1685_p13 = scmp.lt.u32.totalorder %s1676_s22, %s2035_s14 }
  0x6b   : > { %p1684_p8 = por %p1683_p2, %p1682_p4 }
  0x6c   : > { %p1680_p1 = pneg %p1679_p0 }
  0x6d   : > { %p1686_p6 = por %p1685_p13, %p1684_p8 }
  0x6f   : > { %p1687_p3 = pnand %p1686_p6, %p1680_p1 }
  0x71   : > { %1690 = shalt.err (!%p1687_p3)
}
  0x72   : > { %s1691_s8 = scalar_lea.vmem %s2037_s23, 128  ;;  %s1803_s12 = smov [#allocation3]  }
  0x73   : > { %p1692_p5 = scmp.ne.s32.totalorder %s2037_s23, %s1691_s8  ;;  %s1696_s18 = sshll.u32 %s1803_s12, 4  ;;  %s1697_s18 = int_to_ptr.vmem [resolvable:$false] %s1696_s18 }
  0x74   : > { %s1698_s21 = scalar_lea.vmem %s1697_s18, 256  ;;  %p1699_p0 = scmp.lt.s32.totalorder %s2037_s23, %s1697_s18 }
  0x75   : > { %p1694_p7 = pnand %p1692_p5, %p1678_p12  ;;  %p1700_p4 = scmp.lt.s32.totalorder %s1698_s21, %s1691_s8 }
  0x77   : > { %p1695_p9 = pneg %p1694_p7  ;;  %p1701_p2 = por %p1700_p4, %p1699_p0 }
  0x79   : > { %p1702_p8 = pnand %p1701_p2, %p1695_p9 }
  0x7b   : > { %1705 = shalt.err (!%p1702_p8)
}
  0x7c   : > { %1492 = dma.hbm_to_vmem [thread:$0]  (!%p2041_p11), %s2035_s14, 128, %s2037_s23, %s309_s19  }
  0x7d   : > { %p2304_p1 = scmp.ne.s32.totalorder %s2298_s17, 0 }
  0x7e   : > { %s2073_s22 = sand.u32 (!%p2304_p1), 1, %s1780_s28   ;;  %p2305_p12 = scmp.ne.s32.totalorder (!%p2304_p1), %s2295_s15, 0 }
  0x7f   : > { %334 = sbr.rel (%p2304_p1) target bundleno = 1920 (0x780), region = 52  ;;  %s1322_s1 = sshll.u32 (!%p2304_p1), %s2073_s22, 3 }
  0x80   : > { %s337_s16 = scalar_lea.sflag (!%p2304_p1), [#allocation4], %s2073_s22  ;;  %s340_s27 = scalar_lea.vmem (!%p2304_p1), [#allocation3], %s1322_s1 }
  0x86   : > { %1759 = dma.done.wait (%p2305_p12), %s337_s16, 128  }
  0x87   : > { %1761 = vsyncadd (%p2305_p12), %s337_s16, 4294967168  ;;  %p2306_p11 = scmp.ne.s32.totalorder %s2293_s13, 0 }
  0x89   : > { %1763 = dma.done.wait (%p2306_p11), [#allocation7], 512  }
  0x8a   : > { %1765 = vsyncadd (%p2306_p11), [#allocation7], 4294966784 }
  0x8b   : > { %1767 = dma.done.wait (%p2306_p11), [#allocation10], 256  }
  0x8c   : > { %1769 = vsyncadd (%p2306_p11), [#allocation10], 4294967040  ;;  %v1804_v0 = vmov 0.0   ;;  %vm1805_vm0 = vmmov 0   ;;  %v1566_v1 = vld [vmem:[%s2275_s3] sm:$0xff]   ;;  %v1567_v2 = vld [vmem:[#allocation6] sm:$0xff]   ;;  %v428_v8 = vlaneseq }
  0x8d   : > { %1391 = vmatprep.subr.bf16.mxu1 %v1804_v0  ;;  %1383 = vmatprep.subr.bf16.mxu0 %v1804_v0  ;;  %v1568_v3 = vld [vmem:[%s2275_s3 + $0x8] sm:$0xff]   ;;  %vm398_vm1 = vcmask 257024   ;;  %v1569_v6 = vld [vmem:[#allocation6 + $0x8] sm:$0xff]   ;;  %vm444_vm2 = vcmask 261120   ;;  %vm610_vm3 = vcmask 64512   ;;  %s1806_s19 = smov 112  }
  0x8e   : > { %1395 = vmatprep.mubr.msk.bf16.mxu1 %vm1805_vm0, %v1804_v0  ;;  %1387 = vmatprep.mubr.msk.bf16.mxu0 %vm1805_vm0, %v1804_v0  ;;  %v2104_v4 = vld [vmem:[%s340_s27] sm:$0xff]  ;;  %v2117_v9 = vshrl.u32 %v428_v8, 7  ;;  %v2124_v12 = vld [vmem:[%s2278_s6] sm:$0x7]  ;;  %s1807_s24 = smov 120   ;;  %s1808_s26 = smov 104  }
  0x8f   : > { %1392 = vmatpush3.bf16.msra.mxu1 %v1566_v1  ;;  %1384 = vmatpush3.bf16.msra.mxu0 %v1567_v2  ;;  %v397_v5 = vpack.c.bf16 %v2104_v4, %v2104_v4  ;;  %v1570_v28 = vld [vmem:[#allocation8] sm:$0xff]   ;;  %v1571_v29 = vld [vmem:[#allocation8 + $0x8] sm:$0xff]   ;;  %p388_p13 = scmp.lt.s32.totalorder %s1788_s30, 1  ;;  %s2307_s21 = sld [smem:[#allocation18_spill]]  ;;  %vm672_vm4 = vcmask 1043456   ;;  %vm1062_vm5 = vcmask 130048  }
  0x90   : > { %1393 = vmatprep.subr.bf16.mxu1 %v1804_v0  ;;  %1385 = vmatprep.subr.bf16.mxu0 %v1804_v0  ;;  %v490_v10 = vsub.s32 1, %v2117_v9  ;;  %v430_v11 = vsub.s32 0, %v2117_v9  ;;  %v546_v46 = vsub.s32 2, %v2117_v9  ;;  %s1809_s27 = smov 8   ;;  %s1810_s15 = smov 16   ;;  %vm1064_vm6 = vcmask 195584  }
  0x91   : > { %399 = vst.msk [vmem:[#allocation2] sm:$0xf] %vm398_vm1, %v397_v5  ;;  %s389_s8 = scalar_select %p388_p13, %s1788_s30, 1 }
  0x92   : > { %v491_v13 = vrot.slane %v2124_v12, %v490_v10  ;;  %v431_v14 = vrot.slane %v2124_v12, %v430_v11  ;;  %v547_v47 = vrot.slane %v2124_v12, %v546_v46  ;;  %s1811_s17 = smov 24   ;;  %s2199_s13 = scalar_lea.vmem [#allocation11], %s1322_s1 }
  0x93   : > { %1394 = vmatpush3.bf16.msra.mxu1 %v1568_v3  ;;  %1386 = vmatpush3.bf16.msra.mxu0 %v1569_v6  ;;  %s2308_s25 = sld [smem:[#allocation19_spill]]  ;;  %s1186_s12 = sshll.u32 %s2199_s13, 4  ;;  %s2223_s12 = int_to_ptr.vmem [resolvable:$true] %s1186_s12 }
  0x94   : > { %1407 = vmatprep.subr.bf16.mxu1 %v1804_v0  ;;  %1399 = vmatprep.subr.bf16.mxu0 %v1804_v0 }
  0x95   : > { %s390_s16 = scalar_lea.vmem %s2307_s21, %s389_s8  ;;  %s1352_s8 = sshll.u32 %s1788_s30, 7 }
  0x96   : > { %v1336_v39 = vld [vmem:[%s390_s16] ss:$0 sm:$0xff]  ;;  %s2309_s16 = sld [smem:[#allocation20_spill]]  ;;  %s1812_s30 = smov [#allocation11]  }
  0x97   : > { %s1710_s14 = sshll.u32 %s1812_s30, 4  ;;  %s1711_s14 = int_to_ptr.vmem [resolvable:$false] %s1710_s14 }
  0x98   : > { %v400_v7 = vld [vmem:[#allocation2] sm:$0xf]  ;;  %s1712_s23 = scalar_lea.vmem %s1711_s14, 256  ;;  %p1713_p7 = scmp.lt.s32.totalorder %s2223_s12, %s1711_s14 }
  0x99   : > { %1396 = vmatmul.mubr.msk.bf16.vlgmr.msra.gmra.mrb[0].mxu1 %vm444_vm2, %v400_v7  ;;  %1388 = vmatmul.mubr.msk.bf16.vlgmr.msra.gmra.mrb[0].mxu0 %vm444_vm2, %v400_v7 }
  0x9a   : > { %1409 = vmatprep.mubr.msk.bf16.mxu1 %vm1805_vm0, %v1804_v0  ;;  %1403 = vmatprep.mubr.msk.bf16.mxu0 %vm1805_vm0, %v1804_v0 }
  0x9b   : > { %1400 = vmatpush3.bf16.msra.mxu0 %v1570_v28 }
  0x9c   : > { %1401 = vmatprep.subr.bf16.mxu0 %v1804_v0 }
  0x9f   : > { %1402 = vmatpush3.bf16.msra.mxu0 %v1571_v29 }
  0xa0   : > { %1413 = vmatprep.subr.bf16.mxu0 %v1804_v0 }
  0xa2   : > { %1404 = vmatmul.mubr.msk.bf16.vlgmr.msra.gmra.mrb[4].mxu0 %vm444_vm2, %v400_v7 }
  0xa3   : > { %1415 = vmatprep.mubr.msk.bf16.mxu0 %vm1805_vm0, %v1804_v0 }
 0x16c   : > { %v538_v15 = vpop.f32.mrb[0].mxu1  ;;  %v482_v16 = vpop.f32.mrb[0].mxu0 }
 0x16d   : > { %v539_v17 = vadd.f32 %v538_v15, %v491_v13  ;;  %v1397_v18 = vpop.f32.mrb[1].mxu1  ;;  %v483_v19 = vadd.f32 %v482_v16, %v431_v14  ;;  %v1389_v20 = vpop.f32.mrb[1].mxu0 }
 0x16e   : > { %v541_v21 = vpop.f32.mrb[2].mxu1  ;;  %v485_v22 = vpop.f32.mrb[2].mxu0 }
 0x16f   : > { %v602_v23 = vpack.c.bf16 %v539_v17, %v539_v17  ;;  %v1398_v24 = vpop.f32.mrb[3].mxu1  ;;  %v1390_v25 = vpop.f32.mrb[3].mxu0  ;;  %v601_v26 = vpack.c.bf16 %v483_v19, %v483_v19 }
 0x171   : > { %831 = vrot.lane.b32.xlu1 %v602_v23, %s1806_s19  ;;  %720 = vrot.lane.b32.xlu0 %v602_v23, %s1807_s24  ;;  %v615_v27 = vsel %vm610_vm3, %v602_v23, 0 }
 0x172   : > { %1408 = vmatpush3.bf16.xpose.msra.mxu1 %v615_v27 }
 0x173   : > { %1419 = vmatprep.subr.bf16.mxu1 %v1804_v0 }
 0x175   : > { %829 = vrot.lane.b32.xlu1 %v601_v26, %s1806_s19  ;;  %717 = vrot.lane.b32.xlu0 %v601_v26, %s1807_s24  ;;  %v594_v48 = vpop.f32.mrb[4].mxu0 }
 0x176   : > { %v595_v49 = vadd.f32 %v594_v48, %v547_v47  ;;  %v1405_v50 = vpop.f32.mrb[5].mxu0 }
 0x177   : > { %v597_v51 = vpop.f32.mrb[6].mxu0 }
 0x178   : > { %v603_v52 = vpack.c.bf16 %v595_v49, %v595_v49  ;;  %v1406_v53 = vpop.f32.mrb[7].mxu0 }
 0x179   : > { %939 = vrot.lane.b32.xlu1 %v601_v26, %s1808_s26  ;;  %941 = vrot.lane.b32.xlu0 %v602_v23, %s1808_s26 }
 0x17a   : > { %1410 = vmatmul.mubr.msk.bf16.vlgmr.msra.gmra.mrb[4].mxu1 %vm610_vm3, %v601_v26  ;;  %v674_v54 = vsel %vm672_vm4, %v603_v52, 0 }
 0x17b   : > { %1421 = vmatprep.mubr.msk.bf16.mxu1 %vm1805_vm0, %v1804_v0  ;;  %1414 = vmatpush3.bf16.msra.mxu0 %v674_v54 }
 0x17c   : > { %1425 = vmatprep.subr.bf16.mxu0 %v1804_v0 }
 0x1e3   : > { %v721_v30 = vpop.permute.xlu0 %720  ;;  %v832_v32 = vpop.permute.xlu1 %831 }
 0x1e4   : > { %v726_v31 = vsel %vm610_vm3, %v721_v30, 0  ;;  %v837_v34 = vsel %vm610_vm3, %v832_v32, 0 }
 0x1e5   : > { %1420 = vmatpush3.bf16.xpose.msra.mxu1 %v726_v31 }
 0x1e6   : > { %1431 = vmatprep.subr.bf16.mxu1 %v1804_v0 }
 0x1e7   : > { %v718_v33 = vpop.permute.xlu0 %717  ;;  %v830_v36 = vpop.permute.xlu1 %829 }
 0x1eb   : > { %v942_v35 = vpop.permute.xlu0 %941  ;;  %v940_v38 = vpop.permute.xlu1 %939 }
 0x1ec   : > { %1422 = vmatmul.mubr.msk.bf16.vlgmr.msra.gmra.mrb[8].mxu1 %vm610_vm3, %v718_v33  ;;  %v947_v37 = vsel %vm610_vm3, %v942_v35, 0 }
 0x1ed   : > { %1432 = vmatpush3.bf16.xpose.msra.mxu1 %v837_v34  ;;  %1433 = vmatprep.mubr.msk.bf16.mxu1 %vm1805_vm0, %v1804_v0 }
 0x1ee   : > { %1443 = vmatprep.subr.bf16.mxu1 %v1804_v0 }
 0x1f4   : > { %1434 = vmatmul.mubr.msk.bf16.vlgmr.msra.gmra.mrb[12].mxu1 %vm610_vm3, %v830_v36 }
 0x1f5   : > { %1444 = vmatpush3.bf16.xpose.msra.mxu1 %v947_v37  ;;  %1445 = vmatprep.mubr.msk.bf16.mxu1 %vm1805_vm0, %v1804_v0 }
 0x1f6   : > { %1455 = vmatprep.subr.bf16.mxu1 %v1804_v0 }
 0x1fc   : > { %1446 = vmatmul.mubr.msk.bf16.vlgmr.msra.gmra.mrb[16].mxu1 %vm610_vm3, %v940_v38 }
 0x1fd   : > { %1459 = vmatprep.mubr.msk.bf16.mxu1 %vm1805_vm0, %v1804_v0 }
 0x24d   : > { %v651_v40 = vpop.f32.mrb[4].mxu1 }
 0x24e   : > { %v652_v41 = vadd.f32 %v1336_v39, %v651_v40  ;;  %v1411_v42 = vpop.f32.mrb[5].mxu1 }
 0x24f   : > { %v654_v43 = vpop.f32.mrb[6].mxu1 }
 0x250   : > { %v1412_v44 = vpop.f32.mrb[7].mxu1  ;;  %v657_v45 = vsel %vm610_vm3, %v652_v41, -inf }
 0x251   : > { %658 = vmax.xlane.f32.xlu0 %v657_v45 }
 0x2bf   : > { %v762_v55 = vpop.f32.mrb[8].mxu1 }
 0x2c0   : > { %v763_v56 = vadd.f32 %v1336_v39, %v762_v55  ;;  %v1423_v57 = vpop.f32.mrb[9].mxu1 }
 0x2c1   : > { %v765_v58 = vpop.f32.mrb[10].mxu1  ;;  %v1572_v57 = vld [vmem:[#allocation9] sm:$0xff]  }
 0x2c2   : > { %v1424_v59 = vpop.f32.mrb[11].mxu1  ;;  %v768_v60 = vsel %vm610_vm3, %v763_v56, -inf  ;;  %1456 = vmatpush3.bf16.msra.mxu1 %v1572_v57 }
 0x2c3   : > { %769 = vmax.xlane.f32.xlu1 %v768_v60  ;;  %1457 = vmatprep.subr.bf16.mxu1 %v1804_v0 }
 0x2c7   : > { %v873_v61 = vpop.f32.mrb[12].mxu1 }
 0x2c8   : > { %v874_v62 = vadd.f32 %v1336_v39, %v873_v61  ;;  %v1435_v63 = vpop.f32.mrb[13].mxu1 }
 0x2c9   : > { %v876_v1 = vpop.f32.mrb[14].mxu1 }
 0x2ca   : > { %v1436_v2 = vpop.f32.mrb[15].mxu1  ;;  %v879_v3 = vsel %vm610_vm3, %v874_v62, -inf }
 0x2cb   : > { %880 = vmax.xlane.f32.xlu0 %v879_v3 }
 0x2cf   : > { %v983_v5 = vpop.f32.mrb[16].mxu1 }
 0x2d0   : > { %v984_v6 = vadd.f32 %v1336_v39, %v983_v5  ;;  %v1447_v7 = vpop.f32.mrb[17].mxu1 }
 0x2d1   : > { %v986_v8 = vpop.f32.mrb[18].mxu1 }
 0x2d2   : > { %v1448_v9 = vpop.f32.mrb[19].mxu1  ;;  %v989_v10 = vsel %vm610_vm3, %v984_v6, -inf }
 0x2d3   : > { %990 = vmax.xlane.f32.xlu0 %v989_v10 }
 0x2de   : > { %v659_v11 = vpop.xlane.xlu0 %658 }
 0x2df   : > { %v660_v12 = vsub.f32 %v652_v41, %v659_v11 }
 0x2e1   : > { %v661_v13 = vmul.f32 1.442695, %v660_v12 }
 0x2e3   : > { %1574 = vpow2.f32 %v661_v13 }
 0x2ed   : > { %v1575_v14 = vpop.eup %1574 }
 0x2ee   : > { %v663_v15 = vsel %vm610_vm3, %v1575_v14, 0.0 }
 0x2ef   : > { %664 = vadd.xlane.f32.xlu1 %v663_v15 }
 0x300   : > { %781 = vrot.lane.b32.xlu1 %v603_v52, %s1807_s24 }
 0x350   : > { %v770_v16 = vpop.xlane.xlu1 %769 }
 0x351   : > { %v771_v17 = vsub.f32 %v763_v56, %v770_v16 }
 0x353   : > { %v772_v18 = vmul.f32 1.442695, %v771_v17 }
 0x355   : > { %1576 = vpow2.f32 %v772_v18 }
 0x358   : > { %v881_v19 = vpop.xlane.xlu0 %880 }
 0x359   : > { %v882_v20 = vsub.f32 %v874_v62, %v881_v19  ;;  %v1573_v62 = vld [vmem:[#allocation9 + $0x8] sm:$0xff]  }
 0x35a   : > { %1458 = vmatpush3.bf16.msra.mxu1 %v1573_v62  ;;  %v1348_v19 = vld [vmem:[%s2308_s25] ss:$0 sm:$0xff] }
 0x35b   : > { %v883_v21 = vmul.f32 1.442695, %v882_v20 }
 0x35d   : > { %1578 = vpow2.f32 %v883_v21 }
 0x35f   : > { %v1577_v22 = vpop.eup %1576 }
 0x360   : > { %v991_v23 = vpop.xlane.xlu0 %990  ;;  %v774_v24 = vsel %vm610_vm3, %v1577_v22, 0.0 }
 0x361   : > { %v992_v25 = vsub.f32 %v984_v6, %v991_v23  ;;  %775 = vadd.xlane.f32.xlu0 %v774_v24 }
 0x363   : > { %v993_v26 = vmul.f32 1.442695, %v992_v25 }
 0x365   : > { %1580 = vpow2.f32 %v993_v26 }
 0x367   : > { %v1579_v27 = vpop.eup %1578 }
 0x368   : > { %v885_v28 = vsel %vm610_vm3, %v1579_v27, 0.0 }
 0x369   : > { %886 = vadd.xlane.f32.xlu1 %v885_v28 }
 0x36f   : > { %v1581_v29 = vpop.eup %1580 }
 0x370   : > { %v995_v30 = vsel %vm610_vm3, %v1581_v29, 0.0 }
 0x371   : > { %996 = vadd.xlane.f32.xlu0 %v995_v30 }
 0x37a   : > { %1001 = vrot.lane.b32.xlu1 %v603_v52, %s1808_s26 }
 0x37c   : > { %v665_v31 = vpop.xlane.xlu1 %664 }
 0x37d   : > { %1582 = vrcp.f32 %v665_v31 }
 0x380   : > { %v782_v33 = vpop.permute.xlu1 %781 }
 0x381   : > { %v787_v36 = vsel %vm672_vm4, %v782_v33, 0 }
 0x387   : > { %v1583_v32 = vpop.eup %1582  ;;  %891 = vrot.lane.b32.xlu0 %v603_v52, %s1806_s19 }
 0x388   : > { %v667_v34 = vmul.f32 %v1583_v32, %v1575_v14  ;;  %v1349_v32 = vld [vmem:[%s2308_s25 + $0x1] ss:$0 sm:$0xff] }
 0x38a   : > { %v668_v35 = vpack.c.bf16 %v667_v34, %v667_v34  ;;  %v1350_v34 = vld [vmem:[%s2308_s25 + $0x2] ss:$0 sm:$0xff] }
 0x38c   : > { %1416 = vmatmul.mubr.msk.bf16.vlgmr.msra.gmra.mrb[8].mxu0 %vm610_vm3, %v668_v35 }
 0x38d   : > { %1426 = vmatpush3.bf16.msra.mxu0 %v787_v36  ;;  %1427 = vmatprep.mubr.msk.bf16.mxu0 %vm1805_vm0, %v1804_v0 }
 0x38e   : > { %1437 = vmatprep.subr.bf16.mxu0 %v1804_v0 }
 0x3ee   : > { %v776_v37 = vpop.xlane.xlu0 %775 }
 0x3ef   : > { %1584 = vrcp.f32 %v776_v37 }
 0x3f6   : > { %v887_v38 = vpop.xlane.xlu1 %886 }
 0x3f7   : > { %1586 = vrcp.f32 %v887_v38 }
 0x3f9   : > { %v1585_v39 = vpop.eup %1584 }
 0x3fa   : > { %v778_v40 = vmul.f32 %v1585_v39, %v1577_v22  ;;  %v1002_v47 = vpop.permute.xlu1 %1001 }
 0x3fb   : > { %v1007_v49 = vsel %vm672_vm4, %v1002_v47, 0 }
 0x3fc   : > { %v779_v41 = vpack.c.bf16 %v778_v40, %v778_v40 }
 0x3fe   : > { %v997_v42 = vpop.xlane.xlu0 %996  ;;  %1428 = vmatmul.mubr.msk.bf16.vlgmr.msra.gmra.mrb[12].mxu0 %vm610_vm3, %v779_v41 }
 0x3ff   : > { %1588 = vrcp.f32 %v997_v42  ;;  %1439 = vmatprep.mubr.msk.bf16.mxu0 %vm1805_vm0, %v1804_v0 }
 0x401   : > { %v1587_v43 = vpop.eup %1586 }
 0x402   : > { %v889_v44 = vmul.f32 %v1587_v43, %v1579_v27  ;;  %v892_v45 = vpop.permute.xlu0 %891 }
 0x403   : > { %v897_v46 = vsel %vm672_vm4, %v892_v45, 0 }
 0x404   : > { %1438 = vmatpush3.bf16.msra.mxu0 %v897_v46  ;;  %v890_v48 = vpack.c.bf16 %v889_v44, %v889_v44 }
 0x405   : > { %1449 = vmatprep.subr.bf16.mxu0 %v1804_v0 }
 0x407   : > { %1440 = vmatmul.mubr.msk.bf16.vlgmr.msra.gmra.mrb[16].mxu0 %vm610_vm3, %v890_v48 }
 0x408   : > { %1450 = vmatpush3.bf16.msra.mxu0 %v1007_v49  ;;  %1451 = vmatprep.mubr.msk.bf16.mxu0 %vm1805_vm0, %v1804_v0 }
 0x409   : > { %v1589_v50 = vpop.eup %1588 }
 0x40a   : > { %v999_v51 = vmul.f32 %v1589_v50, %v1581_v29 }
 0x40c   : > { %v1000_v52 = vpack.c.bf16 %v999_v51, %v999_v51 }
 0x40f   : > { %1452 = vmatmul.mubr.msk.bf16.vlgmr.msra.gmra.mrb[20].mxu0 %vm610_vm3, %v1000_v52 }
 0x45f   : > { %v710_v53 = vpop.f32.mrb[8].mxu0 }
 0x460   : > { %v1417_v54 = vpop.f32.mrb[9].mxu0 }
 0x461   : > { %v713_v55 = vpop.f32.mrb[10].mxu0 }
 0x462   : > { %v1418_v56 = vpop.f32.mrb[11].mxu0 }
 0x4d1   : > { %v823_v58 = vpop.f32.mrb[12].mxu0 }
 0x4d2   : > { %1050 = vrot.lane.b32.xlu1 %v823_v58, %s1809_s27  ;;  %v1429_v59 = vpop.f32.mrb[13].mxu0  ;;  %s2221_s27 = scalar_lea.hbm %s2309_s16, %s1352_s8 }
 0x4d3   : > { %v826_v60 = vpop.f32.mrb[14].mxu0 }
 0x4d4   : > { %v1430_v61 = vpop.f32.mrb[15].mxu0 }
 0x4da   : > { %v933_v63 = vpop.f32.mrb[16].mxu0 }
 0x4db   : > { %1054 = vrot.lane.b32.xlu0 %v933_v63, %s1810_s15  ;;  %v1441_v1 = vpop.f32.mrb[17].mxu0  ;;  %s1173_s15 = scalar_lea.sflag [#allocation5], %s2073_s22 }
 0x4dc   : > { %v936_v2 = vpop.f32.mrb[18].mxu0 }
 0x4dd   : > { %v1442_v3 = vpop.f32.mrb[19].mxu0 }
 0x4e2   : > { %v1043_v5 = vpop.f32.mrb[20].mxu0 }
 0x4e3   : > { %1058 = vrot.lane.b32.xlu1 %v1043_v5, %s1811_s17  ;;  %v1453_v6 = vpop.f32.mrb[21].mxu0  ;;  %s1706_s17 = scalar_lea.vmem %s2223_s12, 128 }
 0x4e4   : > { %v1046_v7 = vpop.f32.mrb[22].mxu0  ;;  %p1707_p6 = scmp.ne.s32.totalorder %s2223_s12, %s1706_s17  ;;  %p1714_p9 = scmp.lt.s32.totalorder %s1712_s23, %s1706_s17 }
 0x4e5   : > { %v1454_v0 = vpop.f32.mrb[23].mxu0 }
 0x4e6   : > { %p1708_p3 = pnand %p1707_p6, %p2018_p10  ;;  %p1715_p0 = por %p1714_p9, %p1713_p7 }
 0x4e8   : > { %p1709_p5 = pneg %p1708_p3 }
 0x4ea   : > { %p1716_p4 = pnand %p1715_p0, %p1709_p5 }
 0x544   : > { %v1051_v8 = vpop.permute.xlu1 %1050 }
 0x545   : > { %v1061_v10 = vsel %vm610_vm3, %v710_v53, %v1051_v8 }
 0x54d   : > { %v1055_v9 = vpop.permute.xlu0 %1054 }
 0x54e   : > { %v1063_v11 = vsel %vm1062_vm5, %v1061_v10, %v1055_v9 }
 0x555   : > { %v1059_v12 = vpop.permute.xlu1 %1058 }
 0x556   : > { %v1065_v13 = vsel %vm1064_vm6, %v1063_v11, %v1059_v12 }
 0x557   : > { %v1066_v14 = vpack.c.bf16 %v1065_v13, %v1065_v13 }
 0x559   : > { %1460 = vmatmul.mubr.msk.bf16.vlgmr.msra.gmra.mrb[20].mxu1 %vm444_vm2, %v1066_v14 }
 0x62c   : > { %v1116_v15 = vpop.f32.mrb[20].mxu1 }
 0x62d   : > { %1125 = vst.msk [vmem:[%s2199_s13] sm:$0xff] %vm444_vm2, %v1116_v15  ;;  %v1461_v16 = vpop.f32.mrb[21].mxu1 }
 0x62e   : > { %v1119_v17 = vpop.f32.mrb[22].mxu1 }
 0x62f   : > { %v1462_v18 = vpop.f32.mrb[23].mxu1 }
 0x634   : > { %v1136_v20 = vld [vmem:[%s2199_s13] sm:$0xff] }
 0x635   : > { %v1142_v21 = vadd.f32 %v1348_v19, %v1136_v20 }
 0x637   : > { %v1144_v22 = vadd.f32 %v1142_v21, %v2104_v4 }
 0x639   : > { %v1145_v23 = vsel %vm444_vm2, %v1144_v22, 0.0 }
 0x63a   : > { %1146 = vadd.xlane.f32.xlu0 %v1145_v23 }
 0x6c7   : > { %v1147_v24 = vpop.xlane.xlu0 %1146 }
 0x6c8   : > { %v1149_v25 = vmul.f32 0.03125, %v1147_v24 }
 0x6ca   : > { %v1150_v26 = vsub.f32 %v1144_v22, %v1149_v25 }
 0x6cc   : > { %v1151_v27 = vmul.f32 %v1150_v26, %v1150_v26 }
 0x6ce   : > { %v1152_v28 = vsel %vm444_vm2, %v1151_v27, 0.0 }
 0x6cf   : > { %1153 = vadd.xlane.f32.xlu1 %v1152_v28 }
 0x75c   : > { %v1154_v29 = vpop.xlane.xlu1 %1153 }
 0x75d   : > { %v1155_v30 = vmul.f32 0.03125, %v1154_v29 }
 0x75f   : > { %v1156_v31 = vadd.f32 1e-12, %v1155_v30 }
 0x761   : > { %1590 = vrsqrt.f32 %v1156_v31 }
 0x76b   : > { %v1591_v4 = vpop.eup %1590 }
 0x76c   : > { %v1158_v33 = vmul.f32 %v1591_v4, %v1150_v26 }
 0x76e   : > { %v1164_v35 = vmul.f32 %v1349_v32, %v1158_v33 }
 0x770   : > { %v1170_v36 = vadd.f32 %v1350_v34, %v1164_v35 }
 0x772   : > { %1171 = vst.msk [vmem:[%s2199_s13] sm:$0xff] %vm444_vm2, %v1170_v36 }
 0x773   : > { %1719 = shalt.err (!%p1716_p4)
}
 0x774   : > { %s1720_s22 = scalar_lea.hbm %s2221_s27, 128  ;;  %s1724_s19 = scalar_lea.hbm %s2309_s16, 256 }
 0x775   : > { %p1721_p2 = scmp.ne.s32.totalorder %s2221_s27, %s1720_s22  ;;  %p1725_p12 = scmp.lt.u32.totalorder %s2221_s27, %s2309_s16 }
 0x776   : > { %p1726_p11 = scmp.lt.u32.totalorder %s1724_s19, %s1720_s22  ;;  %p1728_p6 = scmp.lt.u32.totalorder %s1720_s22, %s2221_s27 }
 0x777   : > { %p1722_p8 = pnand %p1721_p2, %p2018_p10 }
 0x778   : > { %p1727_p13 = por %p1726_p11, %p1725_p12 }
 0x779   : > { %p1723_p1 = pneg %p1722_p8 }
 0x77a   : > { %p1729_p3 = por %p1728_p6, %p1727_p13 }
 0x77c   : > { %p1730_p5 = pnand %p1729_p3, %p1723_p1 }
 0x77e   : > { %1733 = shalt.err (!%p1730_p5)
}
 0x77f   : > { %1477 = dma.vmem_to_hbm [thread:$0]  (%p2018_p10), %s2223_s12, 128, %s2221_s27, %s1173_s15  }
 0x780 PF: > { %s2310_s8 = sld [smem:[#allocation16_spill]]  ;;  %s2311_s18 = sld [smem:[#allocation17_spill]] }
 0x781   : > { %p2313_p9 = scmp.ge.s32.totalorder %s1796_s10, 2 }
 0x786   : > { %s1198_s21 = sand.u32 1, %s2310_s8   ;;  %p2312_p7 = scmp.ne.s32.totalorder %s2311_s18, 0 }
 0x787   : > { %s1199_s17 = scalar_lea.sflag [#allocation5], %s1198_s21 }
 0x788   : > { %p1494_p0 = pnand %p2313_p9, %p2312_p7 }
 0x78a   : > { %1771 = dma.done.wait (!%p1494_p0), %s1199_s17, 128  }
 0x78b   : > { %1773 = vsyncadd (!%p1494_p0), %s1199_s17, 4294967168  ;;  %s26_s10 = sadd.s32 1, %s1796_s10   ;;  %s2314_s27 = smov %s1780_s28 }
 0x78c   : > { %p23_p4 = scmp.ge.s32.totalorder %s26_s10, 4   ;;  %s2315_s28 = smov %s1784_s29 }
 0x78d   : > { %s2316_s29 = smov %s2030_s11  ;;  %s2317_s30 = smov %s1792_s9 }
 0x78e   : > { %s2318_s9 = smov %s2320_s20  ;;  %25 = sbr.rel (!%p23_p4) target bundleno = 12 (0xc), region = 133 }
 0x795   :  { %1204 = vsyncpa [#allocation4], 1 }
 0x796   :  { %1206 = vsyncpa [#allocation4 + $0x1], 1 }
 0x797   :  { %1207 = vsyncpa [#allocation7], 1 }
 0x798   :  { %1208 = vsyncpa [#allocation10], 1 }
 0x799   :  { %1209 = vsyncpa [#allocation5], 1 }
 0x79a   :  { %1211 = vsyncpa [#allocation5 + $0x1], 1 }

</bundles_post_ra>
